<compile_context>
chip_gen: v5e
topology: v5e:2x2
jax: 0.10.0
libtpu: 0.0.40
codegen_flags: <defaults>
</compile_context>

<pallas_src>
import functools
import math

import numpy as np
import jax
import jax.numpy as jnp
from jax.experimental import pallas as pl

# ----------------------------- model config ---------------------------------
D_MODEL = 32
NHEAD = 4
HEAD_DIM = D_MODEL // NHEAD
DIM_FF = 64
SEQ = 8
BATCH = 2
LN_EPS = 1e-5
_LANES = 128

# Row offsets of each weight matrix inside the packed matrix slab.
_R_WQKV = 0                         # (E, 3E) fused in_proj.weight.T  (rows 0:32)
_R_WO = _R_WQKV + D_MODEL           # (E, E)  out_proj.weight.T       (rows 32:64)
_R_W1 = _R_WO + D_MODEL             # (E, F)  linear1.weight.T        (rows 64:96)
_R_W2 = _R_W1 + D_MODEL             # (F, E)  linear2.weight.T        (rows 96:160)
_MAT_ROWS = _R_W2 + DIM_FF          # 160


# ------------------------------- kernel -------------------------------------
def _layer_norm(y, w, b):
    mu = jnp.mean(y, axis=-1, keepdims=True)
    var = jnp.mean((y - mu) ** 2, axis=-1, keepdims=True)
    return (y - mu) * jax.lax.rsqrt(var + LN_EPS) * w + b


def encoder_block_kernel(x_ref, wm_ref, vb_ref, o_ref, *, batch_size):
    """Fused TransformerEncoderBlock forward (single grid-less invocation).

    x_ref  : (N, E)    flattened tokens, row r = s * B + b (free reshape of (S,B,E))
    wm_ref : (160,128) packed weight-matrix slab (lanes zero-padded to 128)
    vb_ref : (8, 128)  packed bias / LayerNorm-parameter slab
    o_ref  : (N, E)
    """
    E, H, hd, F = D_MODEL, NHEAD, HEAD_DIM, DIM_FF
    x = x_ref[...].astype(jnp.float32)                                   # (N, E)
    n_tok = x.shape[0]

    # ---- fused Q/K/V projection: one (N,E)x(E,3E) MXU pass ------------------
    wqkv = wm_ref[_R_WQKV:_R_WQKV + E, 0:3 * E]                          # (E, 3E)
    bqkv = vb_ref[0:1, 0:3 * E]                                          # (1, 3E)
    qkv = jnp.dot(x, wqkv, preferred_element_type=jnp.float32) + bqkv    # (N, 3E)

    # ---- block-diagonal per-batch attention mask, built in-kernel -----------
    row = jax.lax.broadcasted_iota(jnp.int32, (n_tok, n_tok), 0)
    col = jax.lax.broadcasted_iota(jnp.int32, (n_tok, n_tok), 1)
    neg_mask = jnp.where((row % batch_size) == (col % batch_size), 0.0, -1e30)

    # ---- per-head attention; heads live in static lane slices of qkv --------
    nt_dims = (((1,), (1,)), ((), ()))          # contract last dims: q @ k^T
    ctx_parts = []
    for h in range(H):
        lo = h * hd
        qh = qkv[:, lo:lo + hd]                 # (N, hd), 1/sqrt(hd) pre-folded
        kh = qkv[:, E + lo:E + lo + hd]
        vh = qkv[:, 2 * E + lo:2 * E + lo + hd]
        s = jax.lax.dot_general(qh, kh, nt_dims,
                                preferred_element_type=jnp.float32)      # (N, N)
        s = s + neg_mask                        # restrict attention to same batch
        s = s - jnp.max(s, axis=-1, keepdims=True)
        p = jnp.exp(s)
        p = p / jnp.sum(p, axis=-1, keepdims=True)       # exact normalization
        ctx_parts.append(jnp.dot(p, vh, preferred_element_type=jnp.float32))
    ctx = jnp.concatenate(ctx_parts, axis=-1)   # (N, E), heads packed on lanes

    # ---- output projection: one (N,E)x(E,E) MXU pass -------------------------
    wo = wm_ref[_R_WO:_R_WO + E, 0:E]
    bo = vb_ref[1:2, 0:E]
    a1 = jnp.dot(ctx, wo, preferred_element_type=jnp.float32) + bo

    # ---- residual + LayerNorm 1 (module applies the norm to the sublayer) ---
    ln1w, ln1b = vb_ref[4:5, 0:E], vb_ref[5:6, 0:E]
    src2 = x + _layer_norm(a1, ln1w, ln1b)

    # ---- feed-forward --------------------------------------------------------
    w1 = wm_ref[_R_W1:_R_W1 + E, 0:F]
    b1 = vb_ref[2:3, 0:F]
    w2 = wm_ref[_R_W2:_R_W2 + F, 0:E]
    b2 = vb_ref[3:4, 0:E]
    h1 = jnp.maximum(jnp.dot(src2, w1, preferred_element_type=jnp.float32) + b1, 0.0)
    a2 = jnp.dot(h1, w2, preferred_element_type=jnp.float32) + b2

    # ---- residual + LayerNorm 2 ----------------------------------------------
    ln2w, ln2b = vb_ref[6:7, 0:E], vb_ref[7:8, 0:E]
    out = src2 + _layer_norm(a2, ln2w, ln2b)
    o_ref[...] = out.astype(o_ref.dtype)


# ------------------------- one-time parameter prep ---------------------------
def prepare_params(params):
    """One-time (outside jit) repack of PyTorch-layout params into the two
    kernel slabs:

    matrix slab (160, 128), lanes zero-padded:
        rows   0: 32  Wqkv = [Wq.T * 1/sqrt(hd) | Wk.T | Wv.T]   (E, 3E)
        rows  32: 64  out_proj.weight.T                          (E, E)
        rows  64: 96  linear1.weight.T                           (E, F)
        rows  96:160  linear2.weight.T                           (F, E)
    vector slab (8, 128):
        row 0 bqkv(96, Q part scaled) | 1 out_proj.bias(32) | 2 b1(64) | 3 b2(32)
        row 4 norm1.weight | 5 norm1.bias | 6 norm2.weight | 7 norm2.bias
    """
    E, F, hd = D_MODEL, DIM_FF, HEAD_DIM
    scale = 1.0 / math.sqrt(hd)

    w_in = np.asarray(params["in_proj_weight"], np.float32)    # (3E, E)
    b_in = np.asarray(params["in_proj_bias"], np.float32)      # (3E,)
    wqkv = np.concatenate(
        [w_in[0:E].T * scale, w_in[E:2 * E].T, w_in[2 * E:3 * E].T], axis=1)  # (E, 3E)
    bqkv = np.concatenate(
        [b_in[0:E] * scale, b_in[E:2 * E], b_in[2 * E:3 * E]], axis=0)        # (3E,)

    mat = np.zeros((_MAT_ROWS, _LANES), np.float32)
    mat[_R_WQKV:_R_WQKV + E, 0:3 * E] = wqkv
    mat[_R_WO:_R_WO + E, 0:E] = np.asarray(params["out_proj_weight"], np.float32).T
    mat[_R_W1:_R_W1 + E, 0:F] = np.asarray(params["linear1_weight"], np.float32).T
    mat[_R_W2:_R_W2 + F, 0:E] = np.asarray(params["linear2_weight"], np.float32).T

    vec = np.zeros((8, _LANES), np.float32)
    vec[0, 0:3 * E] = bqkv
    vec[1, 0:E] = np.asarray(params["out_proj_bias"], np.float32)
    vec[2, 0:F] = np.asarray(params["linear1_bias"], np.float32)
    vec[3, 0:E] = np.asarray(params["linear2_bias"], np.float32)
    vec[4, 0:E] = np.asarray(params["norm1_weight"], np.float32)
    vec[5, 0:E] = np.asarray(params["norm1_bias"], np.float32)
    vec[6, 0:E] = np.asarray(params["norm2_weight"], np.float32)
    vec[7, 0:E] = np.asarray(params["norm2_bias"], np.float32)

    return jnp.asarray(mat), jnp.asarray(vec)


# ------------------------------- wrapper -------------------------------------
@jax.jit
def transformer_encoder_block(src, mat_slab, vec_slab):
    """src: (S, B, E) float32 — PyTorch MultiheadAttention (seq, batch, embed) layout."""
    S, B, E = src.shape
    N = S * B
    x2d = src.reshape(N, E)            # free contiguous reshape, no transpose

    out2d = pl.pallas_call(
        functools.partial(encoder_block_kernel, batch_size=B),
        out_shape=jax.ShapeDtypeStruct((N, E), src.dtype),
        # grid-less single launch: every operand is a whole-array VMEM block.
        # 3 input DMAs (tokens + 2 packed weight slabs), 1 output DMA.
    )(x2d, mat_slab, vec_slab)

    return out2d.reshape(S, B, E)      # free reshape back to (S, B, E)
    # TODO(synk): for throughput, batch many sequences per call (N >= 128) and
    # add a token-block grid axis with dimension_semantics=("parallel",) so a
    # v7x chip can use both TensorCores; per-call shapes here follow the spec.


# --------------------------- pure-JAX reference -------------------------------
def reference_block(src, params):
    S, B, E = src.shape
    x = jnp.transpose(src, (1, 0, 2)).astype(jnp.float32)             # (B, S, E)

    qkv = jnp.einsum("bse,fe->bsf", x, params["in_proj_weight"]) + params["in_proj_bias"]
    q, k, v = jnp.split(qkv, 3, axis=-1)

    def split_heads(t):  # (B, S, E) -> (B, H, S, hd)
        return t.reshape(B, S, NHEAD, HEAD_DIM).transpose(0, 2, 1, 3)

    qh, kh, vh = split_heads(q) / math.sqrt(HEAD_DIM), split_heads(k), split_heads(v)
    scores = jnp.einsum("bhqd,bhkd->bhqk", qh, kh)
    p = jax.nn.softmax(scores, axis=-1)
    attn = jnp.einsum("bhqk,bhkd->bhqd", p, vh).transpose(0, 2, 1, 3).reshape(B, S, E)
    a1 = jnp.einsum("bse,fe->bsf", attn, params["out_proj_weight"]) + params["out_proj_bias"]

    def ln(y, w, b):
        mu = jnp.mean(y, -1, keepdims=True)
        var = jnp.mean((y - mu) ** 2, -1, keepdims=True)
        return (y - mu) / jnp.sqrt(var + LN_EPS) * w + b

    src2 = x + ln(a1, params["norm1_weight"], params["norm1_bias"])
    h1 = jax.nn.relu(jnp.einsum("bse,fe->bsf", src2, params["linear1_weight"]) + params["linear1_bias"])
    a2 = jnp.einsum("bsf,ef->bse", h1, params["linear2_weight"]) + params["linear2_bias"]
    out = src2 + ln(a2, params["norm2_weight"], params["norm2_bias"])
    return jnp.transpose(out, (1, 0, 2))


# --------------------------------- main ---------------------------------------
def init_params(key):
    ks = jax.random.split(key, 8)

    def xavier(k, shape):
        fan_out, fan_in = shape
        bound = math.sqrt(6.0 / (fan_in + fan_out))
        return jax.random.uniform(k, shape, jnp.float32, -bound, bound)

    return {
        "in_proj_weight": xavier(ks[0], (3 * D_MODEL, D_MODEL)),
        "in_proj_bias": jnp.zeros((3 * D_MODEL,), jnp.float32),
        "out_proj_weight": xavier(ks[1], (D_MODEL, D_MODEL)),
        "out_proj_bias": jnp.zeros((D_MODEL,), jnp.float32),
        "linear1_weight": xavier(ks[2], (DIM_FF, D_MODEL)),
        "linear1_bias": jax.random.uniform(ks[3], (DIM_FF,), jnp.float32, -0.1, 0.1),
        "linear2_weight": xavier(ks[4], (D_MODEL, DIM_FF)),
        "linear2_bias": jax.random.uniform(ks[5], (D_MODEL,), jnp.float32, -0.1, 0.1),
        "norm1_weight": jnp.ones((D_MODEL,), jnp.float32),
        "norm1_bias": jnp.zeros((D_MODEL,), jnp.float32),
        "norm2_weight": jnp.ones((D_MODEL,), jnp.float32),
        "norm2_bias": jnp.zeros((D_MODEL,), jnp.float32),
    }


if __name__ == "__main__":
    key = jax.random.PRNGKey(0)
    k_src, k_par = jax.random.split(key)
    src = jax.random.normal(k_src, (SEQ, BATCH, D_MODEL), jnp.float32)   # (S, B, E)
    params = init_params(k_par)
    mat_slab, vec_slab = prepare_params(params)   # one-time weight repack, outside jit

    out = transformer_encoder_block(src, mat_slab, vec_slab)
    out = jax.block_until_ready(out)

    ref = reference_block(src, params)
    assert out.shape == (SEQ, BATCH, D_MODEL)
    err = float(jnp.max(jnp.abs(out - ref)))
    assert err < 1e-3, f"mismatch vs reference: max abs err = {err}"

    print("KERNEL_OK")
</pallas_src>

<mosaic_0001>
module attributes {stable_mosaic.version = 11 : i64} {
  func.func @encoder_block_kernel(%arg0: memref<16x32xf32, #tpu.memory_space<vmem>>, %arg1: memref<160x128xf32, #tpu.memory_space<vmem>>, %arg2: memref<8x128xf32, #tpu.memory_space<vmem>>, %arg3: memref<16x32xf32, #tpu.memory_space<vmem>>) attributes {dimension_semantics = [], scalar_prefetch = 0 : i64, scratch_operands = 0 : i64, tpu.core_type = #tpu.core_type<tc>} {
    %c0 = arith.constant 0 : index
    %c0_0 = arith.constant 0 : index
    %0 = vector.load %arg0[%c0, %c0_0] : memref<16x32xf32, #tpu.memory_space<vmem>>, vector<16x32xf32>
    %c0_1 = arith.constant 0 : index
    %c0_2 = arith.constant 0 : index
    %1 = vector.load %arg1[%c0_1, %c0_2] : memref<160x128xf32, #tpu.memory_space<vmem>>, vector<32x96xf32>
    %c0_3 = arith.constant 0 : index
    %c0_4 = arith.constant 0 : index
    %2 = vector.load %arg2[%c0_3, %c0_4] : memref<8x128xf32, #tpu.memory_space<vmem>>, vector<1x96xf32>
    %cst = arith.constant dense<0.000000e+00> : vector<16x96xf32>
    %3 = tpu.matmul %0, %1, %cst {dimension_numbers = #tpu.dot_dimension_numbers<[1], [0], [0], [1], [0, 0, 1, 1], [], []>} : vector<16x32xf32>, vector<32x96xf32>, vector<16x96xf32> -> vector<16x96xf32>
    %4 = vector.broadcast %2 : vector<1x96xf32> to vector<16x96xf32>
    %5 = arith.addf %3, %4 : vector<16x96xf32>
    %6 = tpu.iota {dimensions = array<i32: 0>} : vector<16x16xi32>
    %7 = tpu.iota {dimensions = array<i32: 1>} : vector<16x16xi32>
    %c2_i32 = arith.constant 2 : i32
    %c0_i32 = arith.constant 0 : i32
    %8 = arith.cmpi eq, %c2_i32, %c0_i32 : i32
    %c1_i32 = arith.constant 1 : i32
    %9 = arith.select %8, %c1_i32, %c2_i32 : i32
    %10 = vector.broadcast %9 : i32 to vector<16x16xi32>
    %11 = arith.remsi %6, %10 : vector<16x16xi32>
    %c0_i32_5 = arith.constant 0 : i32
    %12 = vector.broadcast %c0_i32_5 : i32 to vector<16x16xi32>
    %13 = arith.cmpi ne, %11, %12 : vector<16x16xi32>
    %c0_i32_6 = arith.constant 0 : i32
    %14 = vector.broadcast %c0_i32_6 : i32 to vector<16x16xi32>
    %15 = arith.cmpi slt, %11, %14 : vector<16x16xi32>
    %c0_i32_7 = arith.constant 0 : i32
    %16 = arith.cmpi slt, %9, %c0_i32_7 : i32
    %17 = vector.broadcast %16 : i1 to vector<16x16xi1>
    %18 = vector.broadcast %17 : vector<16x16xi1> to vector<16x16xi1>
    %19 = arith.xori %15, %18 : vector<16x16xi1>
    %20 = arith.andi %19, %13 : vector<16x16xi1>
    %21 = vector.broadcast %9 : i32 to vector<16x16xi32>
    %22 = arith.addi %11, %21 : vector<16x16xi32>
    %23 = arith.select %20, %22, %11 : vector<16x16xi1>, vector<16x16xi32>
    %c2_i32_8 = arith.constant 2 : i32
    %c0_i32_9 = arith.constant 0 : i32
    %24 = arith.cmpi eq, %c2_i32_8, %c0_i32_9 : i32
    %c1_i32_10 = arith.constant 1 : i32
    %25 = arith.select %24, %c1_i32_10, %c2_i32_8 : i32
    %26 = vector.broadcast %25 : i32 to vector<16x16xi32>
    %27 = arith.remsi %7, %26 : vector<16x16xi32>
    %c0_i32_11 = arith.constant 0 : i32
    %28 = vector.broadcast %c0_i32_11 : i32 to vector<16x16xi32>
    %29 = arith.cmpi ne, %27, %28 : vector<16x16xi32>
    %c0_i32_12 = arith.constant 0 : i32
    %30 = vector.broadcast %c0_i32_12 : i32 to vector<16x16xi32>
    %31 = arith.cmpi slt, %27, %30 : vector<16x16xi32>
    %c0_i32_13 = arith.constant 0 : i32
    %32 = arith.cmpi slt, %25, %c0_i32_13 : i32
    %33 = vector.broadcast %32 : i1 to vector<16x16xi1>
    %34 = vector.broadcast %33 : vector<16x16xi1> to vector<16x16xi1>
    %35 = arith.xori %31, %34 : vector<16x16xi1>
    %36 = arith.andi %35, %29 : vector<16x16xi1>
    %37 = vector.broadcast %25 : i32 to vector<16x16xi32>
    %38 = arith.addi %27, %37 : vector<16x16xi32>
    %39 = arith.select %36, %38, %27 : vector<16x16xi1>, vector<16x16xi32>
    %40 = arith.cmpi eq, %23, %39 : vector<16x16xi32>
    %cst_14 = arith.constant 0.000000e+00 : f32
    %cst_15 = arith.constant -1.000000e+30 : f32
    %41 = vector.broadcast %cst_14 : f32 to vector<16x16xf32>
    %42 = vector.broadcast %cst_15 : f32 to vector<16x16xf32>
    %43 = arith.select %40, %41, %42 : vector<16x16xi1>, vector<16x16xf32>
    %44 = vector.extract_strided_slice %5 {offsets = [0, 0], sizes = [16, 8], strides = [1, 1]} : vector<16x96xf32> to vector<16x8xf32>
    %45 = vector.extract_strided_slice %5 {offsets = [0, 32], sizes = [16, 8], strides = [1, 1]} : vector<16x96xf32> to vector<16x8xf32>
    %46 = vector.extract_strided_slice %5 {offsets = [0, 64], sizes = [16, 8], strides = [1, 1]} : vector<16x96xf32> to vector<16x8xf32>
    %cst_16 = arith.constant dense<0.000000e+00> : vector<16x16xf32>
    %47 = tpu.matmul %44, %45, %cst_16 {dimension_numbers = #tpu.dot_dimension_numbers<[1], [1], [0], [0], [0, 0, 1, 0], [], []>} : vector<16x8xf32>, vector<16x8xf32>, vector<16x16xf32> -> vector<16x16xf32>
    %48 = arith.addf %47, %43 : vector<16x16xf32>
    %cst_17 = arith.constant dense<0xFF800000> : vector<16xf32>
    %49 = vector.multi_reduction <maximumf>, %48, %cst_17 [1] : vector<16x16xf32> to vector<16xf32>
    %50 = vector.shape_cast %49 : vector<16xf32> to vector<16x1xf32>
    %51 = vector.broadcast %50 : vector<16x1xf32> to vector<16x16xf32>
    %52 = arith.subf %48, %51 : vector<16x16xf32>
    %53 = math.exp %52 : vector<16x16xf32>
    %cst_18 = arith.constant dense<0.000000e+00> : vector<16xf32>
    %54 = vector.multi_reduction <add>, %53, %cst_18 [1] : vector<16x16xf32> to vector<16xf32>
    %55 = vector.shape_cast %54 : vector<16xf32> to vector<16x1xf32>
    %56 = vector.broadcast %55 : vector<16x1xf32> to vector<16x16xf32>
    %57 = arith.divf %53, %56 : vector<16x16xf32>
    %cst_19 = arith.constant dense<0.000000e+00> : vector<16x8xf32>
    %58 = tpu.matmul %57, %46, %cst_19 {dimension_numbers = #tpu.dot_dimension_numbers<[1], [0], [0], [1], [0, 0, 1, 1], [], []>} : vector<16x16xf32>, vector<16x8xf32>, vector<16x8xf32> -> vector<16x8xf32>
    %59 = vector.extract_strided_slice %5 {offsets = [0, 8], sizes = [16, 8], strides = [1, 1]} : vector<16x96xf32> to vector<16x8xf32>
    %60 = vector.extract_strided_slice %5 {offsets = [0, 40], sizes = [16, 8], strides = [1, 1]} : vector<16x96xf32> to vector<16x8xf32>
    %61 = vector.extract_strided_slice %5 {offsets = [0, 72], sizes = [16, 8], strides = [1, 1]} : vector<16x96xf32> to vector<16x8xf32>
    %cst_20 = arith.constant dense<0.000000e+00> : vector<16x16xf32>
    %62 = tpu.matmul %59, %60, %cst_20 {dimension_numbers = #tpu.dot_dimension_numbers<[1], [1], [0], [0], [0, 0, 1, 0], [], []>} : vector<16x8xf32>, vector<16x8xf32>, vector<16x16xf32> -> vector<16x16xf32>
    %63 = arith.addf %62, %43 : vector<16x16xf32>
    %cst_21 = arith.constant dense<0xFF800000> : vector<16xf32>
    %64 = vector.multi_reduction <maximumf>, %63, %cst_21 [1] : vector<16x16xf32> to vector<16xf32>
    %65 = vector.shape_cast %64 : vector<16xf32> to vector<16x1xf32>
    %66 = vector.broadcast %65 : vector<16x1xf32> to vector<16x16xf32>
    %67 = arith.subf %63, %66 : vector<16x16xf32>
    %68 = math.exp %67 : vector<16x16xf32>
    %cst_22 = arith.constant dense<0.000000e+00> : vector<16xf32>
    %69 = vector.multi_reduction <add>, %68, %cst_22 [1] : vector<16x16xf32> to vector<16xf32>
    %70 = vector.shape_cast %69 : vector<16xf32> to vector<16x1xf32>
    %71 = vector.broadcast %70 : vector<16x1xf32> to vector<16x16xf32>
    %72 = arith.divf %68, %71 : vector<16x16xf32>
    %cst_23 = arith.constant dense<0.000000e+00> : vector<16x8xf32>
    %73 = tpu.matmul %72, %61, %cst_23 {dimension_numbers = #tpu.dot_dimension_numbers<[1], [0], [0], [1], [0, 0, 1, 1], [], []>} : vector<16x16xf32>, vector<16x8xf32>, vector<16x8xf32> -> vector<16x8xf32>
    %74 = vector.extract_strided_slice %5 {offsets = [0, 16], sizes = [16, 8], strides = [1, 1]} : vector<16x96xf32> to vector<16x8xf32>
    %75 = vector.extract_strided_slice %5 {offsets = [0, 48], sizes = [16, 8], strides = [1, 1]} : vector<16x96xf32> to vector<16x8xf32>
    %76 = vector.extract_strided_slice %5 {offsets = [0, 80], sizes = [16, 8], strides = [1, 1]} : vector<16x96xf32> to vector<16x8xf32>
    %cst_24 = arith.constant dense<0.000000e+00> : vector<16x16xf32>
    %77 = tpu.matmul %74, %75, %cst_24 {dimension_numbers = #tpu.dot_dimension_numbers<[1], [1], [0], [0], [0, 0, 1, 0], [], []>} : vector<16x8xf32>, vector<16x8xf32>, vector<16x16xf32> -> vector<16x16xf32>
    %78 = arith.addf %77, %43 : vector<16x16xf32>
    %cst_25 = arith.constant dense<0xFF800000> : vector<16xf32>
    %79 = vector.multi_reduction <maximumf>, %78, %cst_25 [1] : vector<16x16xf32> to vector<16xf32>
    %80 = vector.shape_cast %79 : vector<16xf32> to vector<16x1xf32>
    %81 = vector.broadcast %80 : vector<16x1xf32> to vector<16x16xf32>
    %82 = arith.subf %78, %81 : vector<16x16xf32>
    %83 = math.exp %82 : vector<16x16xf32>
    %cst_26 = arith.constant dense<0.000000e+00> : vector<16xf32>
    %84 = vector.multi_reduction <add>, %83, %cst_26 [1] : vector<16x16xf32> to vector<16xf32>
    %85 = vector.shape_cast %84 : vector<16xf32> to vector<16x1xf32>
    %86 = vector.broadcast %85 : vector<16x1xf32> to vector<16x16xf32>
    %87 = arith.divf %83, %86 : vector<16x16xf32>
    %cst_27 = arith.constant dense<0.000000e+00> : vector<16x8xf32>
    %88 = tpu.matmul %87, %76, %cst_27 {dimension_numbers = #tpu.dot_dimension_numbers<[1], [0], [0], [1], [0, 0, 1, 1], [], []>} : vector<16x16xf32>, vector<16x8xf32>, vector<16x8xf32> -> vector<16x8xf32>
    %89 = vector.extract_strided_slice %5 {offsets = [0, 24], sizes = [16, 8], strides = [1, 1]} : vector<16x96xf32> to vector<16x8xf32>
    %90 = vector.extract_strided_slice %5 {offsets = [0, 56], sizes = [16, 8], strides = [1, 1]} : vector<16x96xf32> to vector<16x8xf32>
    %91 = vector.extract_strided_slice %5 {offsets = [0, 88], sizes = [16, 8], strides = [1, 1]} : vector<16x96xf32> to vector<16x8xf32>
    %cst_28 = arith.constant dense<0.000000e+00> : vector<16x16xf32>
    %92 = tpu.matmul %89, %90, %cst_28 {dimension_numbers = #tpu.dot_dimension_numbers<[1], [1], [0], [0], [0, 0, 1, 0], [], []>} : vector<16x8xf32>, vector<16x8xf32>, vector<16x16xf32> -> vector<16x16xf32>
    %93 = arith.addf %92, %43 : vector<16x16xf32>
    %cst_29 = arith.constant dense<0xFF800000> : vector<16xf32>
    %94 = vector.multi_reduction <maximumf>, %93, %cst_29 [1] : vector<16x16xf32> to vector<16xf32>
    %95 = vector.shape_cast %94 : vector<16xf32> to vector<16x1xf32>
    %96 = vector.broadcast %95 : vector<16x1xf32> to vector<16x16xf32>
    %97 = arith.subf %93, %96 : vector<16x16xf32>
    %98 = math.exp %97 : vector<16x16xf32>
    %cst_30 = arith.constant dense<0.000000e+00> : vector<16xf32>
    %99 = vector.multi_reduction <add>, %98, %cst_30 [1] : vector<16x16xf32> to vector<16xf32>
    %100 = vector.shape_cast %99 : vector<16xf32> to vector<16x1xf32>
    %101 = vector.broadcast %100 : vector<16x1xf32> to vector<16x16xf32>
    %102 = arith.divf %98, %101 : vector<16x16xf32>
    %cst_31 = arith.constant dense<0.000000e+00> : vector<16x8xf32>
    %103 = tpu.matmul %102, %91, %cst_31 {dimension_numbers = #tpu.dot_dimension_numbers<[1], [0], [0], [1], [0, 0, 1, 1], [], []>} : vector<16x16xf32>, vector<16x8xf32>, vector<16x8xf32> -> vector<16x8xf32>
    %104 = tpu.concatenate %58, %73, %88, %103 in 1 : vector<16x8xf32>, vector<16x8xf32>, vector<16x8xf32>, vector<16x8xf32> -> vector<16x32xf32>
    %c32 = arith.constant 32 : index
    %c0_32 = arith.constant 0 : index
    %105 = vector.load %arg1[%c32, %c0_32] : memref<160x128xf32, #tpu.memory_space<vmem>>, vector<32x32xf32>
    %c1 = arith.constant 1 : index
    %c0_33 = arith.constant 0 : index
    %106 = vector.load %arg2[%c1, %c0_33] : memref<8x128xf32, #tpu.memory_space<vmem>>, vector<1x32xf32>
    %cst_34 = arith.constant dense<0.000000e+00> : vector<16x32xf32>
    %107 = tpu.matmul %104, %105, %cst_34 {dimension_numbers = #tpu.dot_dimension_numbers<[1], [0], [0], [1], [0, 0, 1, 1], [], []>} : vector<16x32xf32>, vector<32x32xf32>, vector<16x32xf32> -> vector<16x32xf32>
    %108 = vector.broadcast %106 : vector<1x32xf32> to vector<16x32xf32>
    %109 = arith.addf %107, %108 : vector<16x32xf32>
    %c4 = arith.constant 4 : index
    %c0_35 = arith.constant 0 : index
    %110 = vector.load %arg2[%c4, %c0_35] : memref<8x128xf32, #tpu.memory_space<vmem>>, vector<1x32xf32>
    %c5 = arith.constant 5 : index
    %c0_36 = arith.constant 0 : index
    %111 = vector.load %arg2[%c5, %c0_36] : memref<8x128xf32, #tpu.memory_space<vmem>>, vector<1x32xf32>
    %cst_37 = arith.constant dense<0.000000e+00> : vector<16xf32>
    %112 = vector.multi_reduction <add>, %109, %cst_37 [1] : vector<16x32xf32> to vector<16xf32>
    %113 = vector.shape_cast %112 : vector<16xf32> to vector<16x1xf32>
    %cst_38 = arith.constant 3.200000e+01 : f32
    %114 = vector.broadcast %cst_38 : f32 to vector<16x1xf32>
    %115 = arith.divf %113, %114 : vector<16x1xf32>
    %116 = vector.broadcast %115 : vector<16x1xf32> to vector<16x32xf32>
    %117 = arith.subf %109, %116 : vector<16x32xf32>
    %118 = arith.mulf %117, %117 : vector<16x32xf32>
    %cst_39 = arith.constant dense<0.000000e+00> : vector<16xf32>
    %119 = vector.multi_reduction <add>, %118, %cst_39 [1] : vector<16x32xf32> to vector<16xf32>
    %120 = vector.shape_cast %119 : vector<16xf32> to vector<16x1xf32>
    %cst_40 = arith.constant 3.200000e+01 : f32
    %121 = vector.broadcast %cst_40 : f32 to vector<16x1xf32>
    %122 = arith.divf %120, %121 : vector<16x1xf32>
    %123 = vector.broadcast %115 : vector<16x1xf32> to vector<16x32xf32>
    %124 = arith.subf %109, %123 : vector<16x32xf32>
    %cst_41 = arith.constant 9.99999974E-6 : f32
    %125 = vector.broadcast %cst_41 : f32 to vector<16x1xf32>
    %126 = arith.addf %122, %125 : vector<16x1xf32>
    %127 = math.rsqrt %126 : vector<16x1xf32>
    %128 = vector.broadcast %127 : vector<16x1xf32> to vector<16x32xf32>
    %129 = arith.mulf %124, %128 : vector<16x32xf32>
    %130 = vector.broadcast %110 : vector<1x32xf32> to vector<16x32xf32>
    %131 = arith.mulf %129, %130 : vector<16x32xf32>
    %132 = vector.broadcast %111 : vector<1x32xf32> to vector<16x32xf32>
    %133 = arith.addf %131, %132 : vector<16x32xf32>
    %134 = arith.addf %0, %133 : vector<16x32xf32>
    %c64 = arith.constant 64 : index
    %c0_42 = arith.constant 0 : index
    %135 = vector.load %arg1[%c64, %c0_42] : memref<160x128xf32, #tpu.memory_space<vmem>>, vector<32x64xf32>
    %c2 = arith.constant 2 : index
    %c0_43 = arith.constant 0 : index
    %136 = vector.load %arg2[%c2, %c0_43] : memref<8x128xf32, #tpu.memory_space<vmem>>, vector<1x64xf32>
    %c96 = arith.constant 96 : index
    %c0_44 = arith.constant 0 : index
    %137 = vector.load %arg1[%c96, %c0_44] : memref<160x128xf32, #tpu.memory_space<vmem>>, vector<64x32xf32>
    %c3 = arith.constant 3 : index
    %c0_45 = arith.constant 0 : index
    %138 = vector.load %arg2[%c3, %c0_45] : memref<8x128xf32, #tpu.memory_space<vmem>>, vector<1x32xf32>
    %cst_46 = arith.constant dense<0.000000e+00> : vector<16x64xf32>
    %139 = tpu.matmul %134, %135, %cst_46 {dimension_numbers = #tpu.dot_dimension_numbers<[1], [0], [0], [1], [0, 0, 1, 1], [], []>} : vector<16x32xf32>, vector<32x64xf32>, vector<16x64xf32> -> vector<16x64xf32>
    %140 = vector.broadcast %136 : vector<1x64xf32> to vector<16x64xf32>
    %141 = arith.addf %139, %140 : vector<16x64xf32>
    %cst_47 = arith.constant 0.000000e+00 : f32
    %142 = vector.broadcast %cst_47 : f32 to vector<16x64xf32>
    %143 = arith.maximumf %141, %142 : vector<16x64xf32>
    %cst_48 = arith.constant dense<0.000000e+00> : vector<16x32xf32>
    %144 = tpu.matmul %143, %137, %cst_48 {dimension_numbers = #tpu.dot_dimension_numbers<[1], [0], [0], [1], [0, 0, 1, 1], [], []>} : vector<16x64xf32>, vector<64x32xf32>, vector<16x32xf32> -> vector<16x32xf32>
    %145 = vector.broadcast %138 : vector<1x32xf32> to vector<16x32xf32>
    %146 = arith.addf %144, %145 : vector<16x32xf32>
    %c6 = arith.constant 6 : index
    %c0_49 = arith.constant 0 : index
    %147 = vector.load %arg2[%c6, %c0_49] : memref<8x128xf32, #tpu.memory_space<vmem>>, vector<1x32xf32>
    %c7 = arith.constant 7 : index
    %c0_50 = arith.constant 0 : index
    %148 = vector.load %arg2[%c7, %c0_50] : memref<8x128xf32, #tpu.memory_space<vmem>>, vector<1x32xf32>
    %cst_51 = arith.constant dense<0.000000e+00> : vector<16xf32>
    %149 = vector.multi_reduction <add>, %146, %cst_51 [1] : vector<16x32xf32> to vector<16xf32>
    %150 = vector.shape_cast %149 : vector<16xf32> to vector<16x1xf32>
    %cst_52 = arith.constant 3.200000e+01 : f32
    %151 = vector.broadcast %cst_52 : f32 to vector<16x1xf32>
    %152 = arith.divf %150, %151 : vector<16x1xf32>
    %153 = vector.broadcast %152 : vector<16x1xf32> to vector<16x32xf32>
    %154 = arith.subf %146, %153 : vector<16x32xf32>
    %155 = arith.mulf %154, %154 : vector<16x32xf32>
    %cst_53 = arith.constant dense<0.000000e+00> : vector<16xf32>
    %156 = vector.multi_reduction <add>, %155, %cst_53 [1] : vector<16x32xf32> to vector<16xf32>
    %157 = vector.shape_cast %156 : vector<16xf32> to vector<16x1xf32>
    %cst_54 = arith.constant 3.200000e+01 : f32
    %158 = vector.broadcast %cst_54 : f32 to vector<16x1xf32>
    %159 = arith.divf %157, %158 : vector<16x1xf32>
    %160 = vector.broadcast %152 : vector<16x1xf32> to vector<16x32xf32>
    %161 = arith.subf %146, %160 : vector<16x32xf32>
    %cst_55 = arith.constant 9.99999974E-6 : f32
    %162 = vector.broadcast %cst_55 : f32 to vector<16x1xf32>
    %163 = arith.addf %159, %162 : vector<16x1xf32>
    %164 = math.rsqrt %163 : vector<16x1xf32>
    %165 = vector.broadcast %164 : vector<16x1xf32> to vector<16x32xf32>
    %166 = arith.mulf %161, %165 : vector<16x32xf32>
    %167 = vector.broadcast %147 : vector<1x32xf32> to vector<16x32xf32>
    %168 = arith.mulf %166, %167 : vector<16x32xf32>
    %169 = vector.broadcast %148 : vector<1x32xf32> to vector<16x32xf32>
    %170 = arith.addf %168, %169 : vector<16x32xf32>
    %171 = arith.addf %134, %170 : vector<16x32xf32>
    %c0_56 = arith.constant 0 : index
    %c0_57 = arith.constant 0 : index
    %172 = vector.load %arg3[%c0_56, %c0_57] : memref<16x32xf32, #tpu.memory_space<vmem>>, vector<16x32xf32>
    tpu.vector_store %arg3[%c0_56, %c0_57], %171 {strides = array<i32>} : memref<16x32xf32, #tpu.memory_space<vmem>>, vector<16x32xf32>,
    return
  }
}

</mosaic_0001>

<bundles_post_ra>
// kernel: transformer_encoder_block.1
= control target key start
LH: loop header
LB: loop body
LE: loop exit
PB: predicated region body
PF: predicated region fallthrough
CT: control target
= control target key end

     0   :  { %8 = vsyncpa [#allocation3], 0  ;;  %s1370_s0 = inlined_call_operand.hbm [shape: f32[16,32], index: 0, kind: input, shape index: {}]   ;;  %s1371_s1 = inlined_call_operand.hbm [shape: f32[160,128], index: 1, kind: input, shape index: {}]   ;;  %s1372_s2 = inlined_call_operand.hbm [shape: f32[8,128], index: 2, kind: input, shape index: {}]   ;;  %s1373_s3 = inlined_call_operand.hbm [shape: f32[16,32], index: 3, kind: output, shape index: {}]  }
   0x1   :  { %9 = vsyncpa [#allocation6], 0 }
   0x2   :  { %10 = vsyncpa [#allocation4], 0  ;;  %s28_s14 = sshll.u32 %s1371_s1, 4  ;;  %s1136_s15 = smov [#allocation5]   ;;  %s29_s14 = int_to_ptr.hbm [resolvable:$true] %s28_s14 }
   0x3   :  { %s30_s16 = sshll.u32 %s1136_s15, 4  ;;  %s15_s19 = sshll.u32 %s1370_s0, 4  ;;  %s31_s16 = int_to_ptr.vmem [resolvable:$true] %s30_s16  ;;  %s16_s19 = int_to_ptr.hbm [resolvable:$true] %s15_s19 }
   0x4   :  { %s1137_s20 = smov 128   ;;  %s1138_s21 = smov 8  }
   0x5   :  { %36 = dma.hbm_to_vmem [thread:$0]  %s29_s14, 2560, %s31_s16, [#allocation6], %s1137_s20, %s1137_s20, %s1138_s21  }
   0x6   :  { %s1139_s22 = smov [#allocation2]   ;;  %s42_s1 = sshll.u32 %s1372_s2, 4  ;;  %s43_s1 = int_to_ptr.hbm [resolvable:$true] %s42_s1 }
   0x7   :  { %s17_s23 = sshll.u32 %s1139_s22, 4  ;;  %s1140_s0 = smov [#allocation7]   ;;  %s18_s23 = int_to_ptr.vmem [resolvable:$true] %s17_s23 }
   0x8   :  { %23 = dma.hbm_to_vmem [thread:$0]  %s16_s19, 256, %s18_s23, [#allocation3], %s1137_s20, %s1137_s20, %s1138_s21  }
   0x9   :  { %s44_s26 = sshll.u32 %s1140_s0, 4  ;;  %s45_s26 = int_to_ptr.vmem [resolvable:$true] %s44_s26 }
   0xa   :  { %47 = dma.hbm_to_vmem [thread:$0]  %s43_s1, 128, %s45_s26, [#allocation6]  }
   0xb   :  { %1130 = dma.done.wait [#allocation3], 256  }
   0xc   :  { %1131 = vsyncadd [#allocation3], 4294967040 }
   0xd   :  { %1132 = dma.done.wait [#allocation6], 2688  }
   0xe   :  { %1133 = vsyncadd [#allocation6], 4294964608  ;;  %v65_v0 = vld [vmem:[#allocation5 + $0x18] sm:$0xff]  ;;  %v64_v1 = vld [vmem:[#allocation5 + $0x10] sm:$0xff]  ;;  %vm68_vm0 = vcmask 261120   ;;  %s1141_s2 = smov 120   ;;  %v98_v25 = vlaneseq }
   0xf   :  { %87 = vmatpush.msra.mxu0 %v65_v0  ;;  %v63_v2 = vld [vmem:[#allocation5 + $0x8] sm:$0xff]  ;;  %v62_v3 = vld [vmem:[#allocation5] sm:$0xff]  ;;  %v1192_v4 = vld [vmem:[#allocation2] sm:$0xff]  ;;  %s1142_s27 = smov 88   ;;  %s1143_s28 = smov 96   ;;  %vm149_vm1 = vcmask 64512  }
  0x10   :  { %v1196_v5 = vld [vmem:[#allocation2 + $0x8] sm:$0xff]  ;;  %v984_v6 = vld [vmem:[#allocation7] ss:$0 sm:$0xff]  ;;  %s1144_s29 = smov 104   ;;  %s1145_s30 = smov 72   ;;  %v99_v26 = vshrl.u32 %v98_v25, 7 }
  0x11   :  { %88 = vmatpush.msra.mxu0 %v64_v1  ;;  %s1146_s4 = smov 80   ;;  %s1147_s5 = smov 112   ;;  %v102_v27 = vand.u32 127, %v98_v25  ;;  %v1148_v31 = vmov -1e+30   ;;  %vm181_vm3 = vcmask 130048  }
  0x12   :  { %v107_v28 = vand.u32 1, %v99_v26  ;;  %v100_v30 = vadd.s32 8, %v99_v26  ;;  %s1149_s6 = smov 56   ;;  %s1150_s7 = smov 64  }
  0x13   :  { %89 = vmatpush.msra.mxu0 %v63_v2  ;;  %v131_v29 = vand.u32 1, %v102_v27  ;;  %s1151_s8 = smov 48   ;;  %s1152_s9 = smov 40  }
  0x14   :  { %v114_v33 = vand.u32 1, %v100_v30  ;;  %s1153_s10 = smov 16   ;;  %s1154_s11 = smov 24  }
  0x15   :  { %90 = vmatpush.msra.mxu0 %v62_v3  ;;  %vm139_vm2 = vcmp.eq.s32.totalorder %v107_v28, %v131_v29  ;;  %s1156_s12 = smov [#allocation8]   ;;  %s897_s16 = sshll.u32 %s1373_s3, 4  ;;  %s898_s16 = int_to_ptr.hbm [resolvable:$true] %s897_s16 }
  0x16   :  { %911 = vmatmul.msk.f32.vlgmr.msra.gmra.mxu0 %vm68_vm0, %v1192_v4  ;;  %v141_v32 = vsel %vm139_vm2, 0.0, %v1148_v31  ;;  %vm140_vm4 = vcmp.eq.s32.totalorder %v114_v33, %v131_v29  ;;  %s895_s13 = sshll.u32 %s1156_s12, 4  ;;  %s896_s13 = int_to_ptr.vmem [resolvable:$true] %s895_s13 }
  0x17   :  { %v142_v38 = vsel %vm140_vm4, 0.0, %v1148_v31 }
  0x1e   :  { %912 = vmatmul.msk.f32.gmra.mxu0 %vm68_vm0, %v1196_v5 }
  0x93   :  { %v92_v7 = vpop.f32.mrf.mxu0 }
  0x94   :  { %v1200_v8 = vadd.f32 %v984_v6, %v92_v7 }
  0x96   :  { %265 = vrot.lane.b32.xlu2 %v1200_v8, %s1141_s2 }
  0x9b   :  { %v95_v9 = vpop.f32.mrf.mxu0 }
  0x9c   :  { %v1203_v10 = vadd.f32 %v984_v6, %v95_v9 }
  0x9e   :  { %271 = vrot.lane.b32.xlu1 %v1203_v10, %s1142_s27  ;;  %147 = vrot.lane.b32.xlu0 %v1203_v10, %s1143_s28  ;;  %v1249_v59 = vpack.i.bf16 %v1200_v8, %v1203_v10 }
  0x9f   :  { %267 = vrot.lane.b32.xlu2 %v1203_v10, %s1141_s2 }
  0xa6   :  { %269 = vrot.lane.b32.xlu1 %v1200_v8, %s1142_s27  ;;  %145 = vrot.lane.b32.xlu0 %v1200_v8, %s1143_s28 }
  0xa7   :  { %509 = vrot.lane.b32.xlu2 %v1200_v8, %s1144_s29 }
  0xae   :  { %513 = vrot.lane.b32.xlu1 %v1200_v8, %s1145_s30  ;;  %515 = vrot.lane.b32.xlu0 %v1203_v10, %s1145_s30 }
  0xaf   :  { %511 = vrot.lane.b32.xlu2 %v1203_v10, %s1144_s29 }
  0xb6   :  { %391 = vrot.lane.b32.xlu1 %v1200_v8, %s1146_s4  ;;  %393 = vrot.lane.b32.xlu0 %v1203_v10, %s1146_s4 }
  0xbe   :  { %389 = vrot.lane.b32.xlu1 %v1203_v10, %s1147_s5  ;;  %387 = vrot.lane.b32.xlu0 %v1200_v8, %s1147_s5 }
  0xf0   :  { %v266_v13 = vpop.permute.xlu2 %265 }
  0xf9   :  { %v268_v16 = vpop.permute.xlu2 %267 }
 0x101   :  { %v510_v20 = vpop.permute.xlu2 %509 }
 0x109   :  { %v512_v23 = vpop.permute.xlu2 %511 }
 0x110   :  { %v272_v11 = vpop.permute.xlu1 %271  ;;  %v148_v12 = vpop.permute.xlu0 %147 }
 0x111   :  { %913 = vmatpush.xpose.msk.msra.mxu1 %vm149_vm1, %v148_v12  ;;  %919 = vmatpush.xpose.msk.msra.mxu3 %vm149_vm1, %v272_v11 }
 0x118   :  { %v270_v14 = vpop.permute.xlu1 %269  ;;  %v146_v15 = vpop.permute.xlu0 %145 }
 0x119   :  { %914 = vmatpush.xpose.msk.msra.mxu1 %vm149_vm1, %v146_v15  ;;  %920 = vmatpush.xpose.msk.msra.mxu3 %vm149_vm1, %v270_v14 }
 0x11c   :  { %915 = vmatmul.msk.f32.vlgmr.msra.gmra.mxu1 %vm149_vm1, %v1200_v8  ;;  %921 = vmatmul.msk.f32.vlgmr.msra.gmra.mxu3 %vm149_vm1, %v266_v13 }
 0x120   :  { %v516_v17 = vpop.permute.xlu0 %515  ;;  %v514_v18 = vpop.permute.xlu1 %513 }
 0x121   :  { %931 = vmatpush.xpose.msk.msrb.mxu3 %vm149_vm1, %v516_v17 }
 0x124   :  { %916 = vmatmul.msk.f32.gmra.mxu1 %vm149_vm1, %v1203_v10  ;;  %922 = vmatmul.msk.f32.gmra.mxu3 %vm149_vm1, %v268_v16 }
 0x125   :  { %932 = vmatpush.xpose.msk.msrb.mxu3 %vm149_vm1, %v514_v18 }
 0x128   :  { %v394_v19 = vpop.permute.xlu0 %393  ;;  %v392_v21 = vpop.permute.xlu1 %391 }
 0x129   :  { %925 = vmatpush.xpose.msk.msrb.mxu0 %vm149_vm1, %v394_v19 }
 0x12c   :  { %933 = vmatmul.msk.f32.vlgmr.msrb.gmra.mxu3 %vm149_vm1, %v510_v20 }
 0x12d   :  { %926 = vmatpush.xpose.msk.msrb.mxu0 %vm149_vm1, %v392_v21 }
 0x130   :  { %v388_v22 = vpop.permute.xlu0 %387  ;;  %v390_v24 = vpop.permute.xlu1 %389 }
 0x131   :  { %927 = vmatmul.msk.f32.vlgmr.msrb.gmra.mxu0 %vm149_vm1, %v388_v22 }
 0x134   :  { %934 = vmatmul.msk.f32.gmra.mxu3 %vm149_vm1, %v512_v23 }
 0x139   :  { %928 = vmatmul.msk.f32.gmra.mxu0 %vm149_vm1, %v390_v24 }
 0x199   :  { %v175_v34 = vpop.f32.mrf.mxu1 }
 0x19a   :  { %v176_v35 = vadd.f32 %v175_v34, %v141_v32 }
 0x19c   :  { %v182_v36 = vsel %vm181_vm3, %v176_v35, -inf }
 0x19d   :  { %183 = vmax.xlane.f32.xlu2 %v182_v36 }
 0x19f   :  { %v298_v37 = vpop.f32.mrf.mxu3 }
 0x1a0   :  { %v299_v39 = vadd.f32 %v298_v37, %v141_v32 }
 0x1a1   :  { %v178_v40 = vpop.f32.mrf.mxu1 }
 0x1a2   :  { %v179_v41 = vadd.f32 %v178_v40, %v142_v38  ;;  %v304_v42 = vsel %vm181_vm3, %v299_v39, -inf }
 0x1a3   :  { %305 = vmax.xlane.f32.xlu1 %v304_v42 }
 0x1a4   :  { %v185_v43 = vsel %vm181_vm3, %v179_v41, -inf }
 0x1a5   :  { %186 = vmax.xlane.f32.xlu0 %v185_v43 }
 0x1a7   :  { %v301_v44 = vpop.f32.mrf.mxu3 }
 0x1a8   :  { %v302_v55 = vadd.f32 %v301_v44, %v142_v38 }
 0x1aa   :  { %v307_v56 = vsel %vm181_vm3, %v302_v55, -inf }
 0x1ae   :  { %v420_v45 = vpop.f32.mrf.mxu0 }
 0x1af   :  { %v421_v46 = vadd.f32 %v420_v45, %v141_v32  ;;  %v542_v47 = vpop.f32.mrf.mxu3 }
 0x1b0   :  { %v543_v57 = vadd.f32 %v542_v47, %v141_v32 }
 0x1b1   :  { %v426_v48 = vsel %vm181_vm3, %v421_v46, -inf }
 0x1b2   :  { %427 = vmax.xlane.f32.xlu0 %v426_v48  ;;  %v548_v58 = vsel %vm181_vm3, %v543_v57, -inf }
 0x1b6   :  { %v423_v49 = vpop.f32.mrf.mxu0 }
 0x1b7   :  { %v424_v50 = vadd.f32 %v423_v49, %v142_v38  ;;  %v545_v51 = vpop.f32.mrf.mxu3 }
 0x1b8   :  { %v1240_v52 = vadd.f32 %v545_v51, %v142_v38 }
 0x1b9   :  { %v429_v53 = vsel %vm181_vm3, %v424_v50, -inf }
 0x1ba   :  { %430 = vmax.xlane.f32.xlu2 %v429_v53  ;;  %v551_v54 = vsel %vm181_vm3, %v1240_v52, -inf }
 0x1bb   :  { %552 = vmax.xlane.f32.xlu1 %v551_v54 }
 0x1c2   :  { %308 = vmax.xlane.f32.xlu2 %v307_v56 }
 0x1ca   :  { %549 = vmax.xlane.f32.xlu2 %v548_v58 }
 0x1d4   :  { %970 = vrot.lane.b32.xlu1 %v1249_v59, %s1149_s6 }
 0x210   :  { %v184_v60 = vpop.xlane.xlu2 %183 }
 0x211   :  { %v188_v61 = vsub.f32 %v176_v35, %v184_v60 }
 0x213   :  { %v190_v62 = vmul.f32 1.442695, %v188_v61 }
 0x215   :  { %992 = vpow2.f32 %v190_v62 }
 0x216   :  { %v306_v8 = vpop.xlane.xlu1 %305 }
 0x217   :  { %v310_v11 = vsub.f32 %v299_v39, %v306_v8 }
 0x218   :  { %v187_v63 = vpop.xlane.xlu0 %186 }
 0x219   :  { %v189_v0 = vsub.f32 %v179_v41, %v187_v63  ;;  %v312_v13 = vmul.f32 1.442695, %v310_v11 }
 0x21b   :  { %v1252_v1 = vpop.eup %992  ;;  %v192_v2 = vmul.f32 1.442695, %v189_v0 }
 0x21c   :  { %v194_v3 = vsel %vm181_vm3, %v1252_v1, 0.0 }
 0x21d   :  { %994 = vpow2.f32 %v192_v2  ;;  %195 = vadd.xlane.f32.xlu0 %v194_v3 }
 0x223   :  { %v1256_v6 = vpop.eup %994 }
 0x224   :  { %v197_v7 = vsel %vm181_vm3, %v1256_v6, 0.0 }
 0x225   :  { %198 = vadd.xlane.f32.xlu1 %v197_v7  ;;  %v428_v9 = vpop.xlane.xlu0 %427 }
 0x226   :  { %v432_v10 = vsub.f32 %v421_v46, %v428_v9 }
 0x228   :  { %v434_v12 = vmul.f32 1.442695, %v432_v10 }
 0x22a   :  { %996 = vpow2.f32 %v434_v12 }
 0x22b   :  { %998 = vpow2.f32 %v312_v13 }
 0x22d   :  { %v431_v14 = vpop.xlane.xlu2 %430 }
 0x22e   :  { %v433_v25 = vsub.f32 %v424_v50, %v431_v14  ;;  %v553_v29 = vpop.xlane.xlu1 %552 }
 0x22f   :  { %v555_v31 = vsub.f32 %v1240_v52, %v553_v29 }
 0x230   :  { %v1260_v15 = vpop.eup %996  ;;  %v436_v28 = vmul.f32 1.442695, %v433_v25 }
 0x231   :  { %965 = vrot.lane.b32.xlu0 %v1249_v59, %s1150_s7  ;;  %v438_v16 = vsel %vm181_vm3, %v1260_v15, 0.0  ;;  %v1265_v18 = vpop.eup %998  ;;  %v558_v33 = vmul.f32 1.442695, %v555_v31 }
 0x232   :  { %439 = vadd.xlane.f32.xlu2 %v438_v16  ;;  %v316_v21 = vsel %vm181_vm3, %v1265_v18, 0.0 }
 0x235   :  { %v309_v17 = vpop.xlane.xlu2 %308 }
 0x236   :  { %v311_v19 = vsub.f32 %v302_v55, %v309_v17 }
 0x238   :  { %v314_v20 = vmul.f32 1.442695, %v311_v19 }
 0x23a   :  { %1000 = vpow2.f32 %v314_v20  ;;  %317 = vadd.xlane.f32.xlu2 %v316_v21 }
 0x23d   :  { %v550_v22 = vpop.xlane.xlu2 %549 }
 0x23e   :  { %v554_v23 = vsub.f32 %v543_v57, %v550_v22 }
 0x240   :  { %v1269_v24 = vpop.eup %1000  ;;  %v556_v26 = vmul.f32 1.442695, %v554_v23 }
 0x241   :  { %v319_v27 = vsel %vm181_vm3, %v1269_v24, 0.0 }
 0x242   :  { %1002 = vpow2.f32 %v556_v26  ;;  %320 = vadd.xlane.f32.xlu1 %v319_v27 }
 0x243   :  { %1004 = vpow2.f32 %v436_v28 }
 0x244   :  { %1006 = vpow2.f32 %v558_v33 }
 0x246   :  { %v971_v38 = vpop.permute.xlu1 %970 }
 0x247   :  { %v972_v63 = vunpack.i.l.bf16 %v971_v38  ;;  %v973_v3 = vunpack.i.h.bf16 %v971_v38 }
 0x248   :  { %v1273_v30 = vpop.eup %1002 }
 0x249   :  { %v560_v32 = vsel %vm181_vm3, %v1273_v30, 0.0  ;;  %v1278_v34 = vpop.eup %1004 }
 0x24a   :  { %561 = vadd.xlane.f32.xlu2 %v560_v32  ;;  %v441_v35 = vsel %vm181_vm3, %v1278_v34, 0.0  ;;  %v1282_v36 = vpop.eup %1006 }
 0x24b   :  { %v563_v37 = vsel %vm181_vm3, %v1282_v36, 0.0 }
 0x252   :  { %442 = vadd.xlane.f32.xlu2 %v441_v35 }
 0x25b   :  { %564 = vadd.xlane.f32.xlu0 %v563_v37  ;;  %980 = vrot.lane.b32.xlu1 %v1249_v59, %s1151_s8 }
 0x26a   :  { %975 = vrot.lane.b32.xlu2 %v1249_v59, %s1152_s9 }
 0x290   :  { %v196_v39 = vpop.xlane.xlu0 %195 }
 0x291   :  { %1008 = vrcp.f32 %v196_v39  ;;  %v211_v45 = vand.u32 2147483648, %v196_v39  ;;  %vm205_vm6 = vweird.f32 %v196_v39  ;;  %v209_v48 = vand.u32 2147483647, %v196_v39 }
 0x293   :  { %v212_v51 = vor.u32 1.1754944e-38, %v211_v45  ;;  %vm210_vm8 = vcmp.eq.f32.partialorder %v209_v48, 8.507059e+37 }
 0x297   :  { %v1009_v40 = vpop.eup %1008 }
 0x298   :  { %v201_v41 = vmul.f32 %v1009_v40, %v196_v39  ;;  %v199_v42 = vpop.xlane.xlu1 %198  ;;  %vm206_vm5 = vweird.f32 %v1009_v40 }
 0x299   :  { %1010 = vrcp.f32 %v199_v42  ;;  %vm207_vm7 = vmor %vm205_vm6, %vm206_vm5  ;;  %v226_v58 = vand.u32 2147483648, %v199_v42  ;;  %vm220_vm10 = vweird.f32 %v199_v42  ;;  %v224_v62 = vand.u32 2147483647, %v199_v42 }
 0x29a   :  { %v202_v43 = vsub.f32 1.0, %v201_v41 }
 0x29b   :  { %v227_v2 = vor.u32 1.1754944e-38, %v226_v58  ;;  %vm225_vm12 = vcmp.eq.f32.partialorder %v224_v62, 8.507059e+37 }
 0x29c   :  { %v203_v44 = vmul.f32 %v1009_v40, %v202_v43 }
 0x29e   :  { %v204_v46 = vadd.f32 %v1009_v40, %v203_v44 }
 0x29f   :  { %v1011_v47 = vpop.eup %1010 }
 0x2a0   :  { %v216_v49 = vmul.f32 %v1011_v47, %v199_v42  ;;  %v208_v50 = vsel %vm207_vm7, %v1009_v40, %v204_v46  ;;  %vm221_vm9 = vweird.f32 %v1011_v47 }
 0x2a1   :  { %v213_v56 = vsel %vm210_vm8, %v212_v51, %v208_v50  ;;  %vm222_vm11 = vmor %vm220_vm10, %vm221_vm9 }
 0x2a2   :  { %v217_v52 = vsub.f32 1.0, %v216_v49  ;;  %v214_v60 = vmul.f32 %v1252_v1, %v213_v56 }
 0x2a3   :  { %v966_v53 = vpop.permute.xlu0 %965 }
 0x2a4   :  { %v218_v54 = vmul.f32 %v1011_v47, %v217_v52  ;;  %v967_v55 = vunpack.i.l.bf16 %v966_v53  ;;  %v968_v59 = vunpack.i.h.bf16 %v966_v53 }
 0x2a5   :  { %v1288_v57 = vpop.xlane.xlu2 %439 }
 0x2a6   :  { %256 = vmatpush.msra.mxu2 %v967_v55  ;;  %v219_v61 = vadd.f32 %v1011_v47, %v218_v54  ;;  %v455_v44 = vand.u32 2147483648, %v1288_v57  ;;  %vm449_vm9 = vweird.f32 %v1288_v57 }
 0x2a8   :  { %257 = vmatpush.msra.mxu2 %v968_v59  ;;  %v223_v0 = vsel %vm222_vm11, %v1011_v47, %v219_v61  ;;  %v453_v47 = vand.u32 2147483647, %v1288_v57  ;;  %v456_v53 = vor.u32 1.1754944e-38, %v455_v44 }
 0x2a9   :  { %917 = vmatmul.msk.f32.vlgmr.msra.gmra.mxu2 %vm181_vm3, %v214_v60  ;;  %v228_v7 = vsel %vm225_vm12, %v227_v2, %v223_v0 }
 0x2aa   :  { %378 = vmatpush.msrb.mxu2 %v972_v63  ;;  %v229_v9 = vmul.f32 %v1256_v6, %v228_v7 }
 0x2ac   :  { %379 = vmatpush.msrb.mxu2 %v973_v3 }
 0x2ad   :  { %v318_v8 = vpop.xlane.xlu2 %317 }
 0x2ae   :  { %1012 = vrcp.f32 %v318_v8  ;;  %v333_v16 = vand.u32 2147483648, %v318_v8  ;;  %v331_v19 = vand.u32 2147483647, %v318_v8  ;;  %vm327_vm14 = vweird.f32 %v318_v8 }
 0x2af   :  { %1014 = vrcp.f32 %v1288_v57 }
 0x2b0   :  { %v334_v21 = vor.u32 1.1754944e-38, %v333_v16  ;;  %vm332_vm2 = vcmp.eq.f32.partialorder %v331_v19, 8.507059e+37 }
 0x2b1   :  { %918 = vmatmul.msk.f32.gmra.mxu2 %vm181_vm3, %v229_v9 }
 0x2b4   :  { %v1013_v1 = vpop.eup %1012 }
 0x2b5   :  { %v323_v10 = vmul.f32 %v1013_v1, %v318_v8  ;;  %v321_v11 = vpop.xlane.xlu1 %320  ;;  %v1295_v12 = vpop.eup %1014  ;;  %vm328_vm13 = vweird.f32 %v1013_v1 }
 0x2b6   :  { %1016 = vrcp.f32 %v321_v11  ;;  %v445_v17 = vmul.f32 %v1295_v12, %v1288_v57  ;;  %vm329_vm15 = vmor %vm327_vm14, %vm328_vm13  ;;  %v348_v29 = vand.u32 2147483648, %v321_v11  ;;  %v346_v33 = vand.u32 2147483647, %v321_v11 }
 0x2b7   :  { %v324_v13 = vsub.f32 1.0, %v323_v10  ;;  %vm342_vm5 = vweird.f32 %v321_v11  ;;  %vm450_vm8 = vweird.f32 %v1295_v12  ;;  %vm454_vm13 = vcmp.eq.f32.partialorder %v453_v47, 8.507059e+37 }
 0x2b8   :  { %v446_v26 = vsub.f32 1.0, %v445_v17  ;;  %v349_v39 = vor.u32 1.1754944e-38, %v348_v29  ;;  %vm347_vm7 = vcmp.eq.f32.partialorder %v346_v33, 8.507059e+37  ;;  %vm1308_vm10 = vmor %vm449_vm9, %vm450_vm8 }
 0x2b9   :  { %v325_v14 = vmul.f32 %v1013_v1, %v324_v13 }
 0x2ba   :  { %v447_v35 = vmul.f32 %v1295_v12, %v446_v26 }
 0x2bb   :  { %v326_v20 = vadd.f32 %v1013_v1, %v325_v14 }
 0x2bc   :  { %v1017_v6 = vpop.eup %1016  ;;  %v448_v43 = vadd.f32 %v1295_v12, %v447_v35 }
 0x2bd   :  { %v338_v22 = vmul.f32 %v1017_v6, %v321_v11  ;;  %v562_v23 = vpop.xlane.xlu2 %561  ;;  %v330_v25 = vsel %vm329_vm15, %v1013_v1, %v326_v20  ;;  %vm343_vm4 = vweird.f32 %v1017_v6 }
 0x2be   :  { %1018 = vrcp.f32 %v562_v23  ;;  %v335_v28 = vsel %vm332_vm2, %v334_v21, %v330_v25  ;;  %vm344_vm6 = vmor %vm342_vm5, %vm343_vm4  ;;  %v577_v48 = vand.u32 2147483648, %v562_v23  ;;  %v575_v51 = vand.u32 2147483647, %v562_v23 }
 0x2bf   :  { %v339_v27 = vsub.f32 1.0, %v338_v22  ;;  %v336_v31 = vmul.f32 %v1265_v18, %v335_v28  ;;  %v452_v52 = vsel %vm1308_vm10, %v1295_v12, %v448_v43  ;;  %vm571_vm12 = vweird.f32 %v562_v23 }
 0x2c0   :  { %v578_v55 = vor.u32 1.1754944e-38, %v577_v48  ;;  %vm576_vm15 = vcmp.eq.f32.partialorder %v575_v51, 8.507059e+37  ;;  %v457_v60 = vsel %vm454_vm13, %v456_v53, %v452_v52  ;;  %v985_v52 = vld [vmem:[#allocation7 + $0x1] ss:$0 sm:$0xff] }
 0x2c1   :  { %v340_v32 = vmul.f32 %v1017_v6, %v339_v27  ;;  %923 = vmatmul.msk.f32.vlgmr.msrb.gmra.mxu2 %vm181_vm3, %v336_v31  ;;  %v458_v9 = vmul.f32 %v1260_v15, %v457_v60 }
 0x2c3   :  { %v341_v37 = vadd.f32 %v1017_v6, %v340_v32 }
 0x2c4   :  { %v1019_v38 = vpop.eup %1018 }
 0x2c5   :  { %v567_v40 = vmul.f32 %v1019_v38, %v562_v23  ;;  %v443_v41 = vpop.xlane.xlu2 %442  ;;  %v345_v42 = vsel %vm344_vm6, %v1017_v6, %v341_v37  ;;  %vm572_vm11 = vweird.f32 %v1019_v38 }
 0x2c6   :  { %1020 = vrcp.f32 %v443_v41  ;;  %v350_v18 = vsel %vm347_vm7, %v349_v39, %v345_v42  ;;  %vm573_vm14 = vmor %vm571_vm12, %vm572_vm11  ;;  %v470_v3 = vand.u32 2147483648, %v443_v41  ;;  %v468_v11 = vand.u32 2147483647, %v443_v41  ;;  %v663_v39 = vld [vmem:[#allocation5 + $0x28] sm:$0xff] }
 0x2c7   :  { %v568_v45 = vsub.f32 1.0, %v567_v40  ;;  %v351_v46 = vmul.f32 %v1269_v24, %v350_v18  ;;  %vm464_vm4 = vweird.f32 %v443_v41  ;;  %v662_v40 = vld [vmem:[#allocation5 + $0x20] sm:$0xff]  ;;  %vm659_vm11 = vcmask 195584  }
 0x2c8   :  { %v471_v13 = vor.u32 1.1754944e-38, %v470_v3  ;;  %vm469_vm6 = vcmp.eq.f32.partialorder %v468_v11, 8.507059e+37 }
 0x2c9   :  { %v569_v50 = vmul.f32 %v1019_v38, %v568_v45  ;;  %924 = vmatmul.msk.f32.gmra.mxu2 %vm181_vm3, %v351_v46 }
 0x2cb   :  { %v570_v24 = vadd.f32 %v1019_v38, %v569_v50 }
 0x2cc   :  { %v1021_v54 = vpop.eup %1020 }
 0x2cd   :  { %v574_v56 = vsel %vm573_vm14, %v1019_v38, %v570_v24  ;;  %v460_v57 = vmul.f32 %v1021_v54, %v443_v41  ;;  %v981_v58 = vpop.permute.xlu1 %980  ;;  %v976_v59 = vpop.permute.xlu2 %975  ;;  %vm465_vm2 = vweird.f32 %v1021_v54  ;;  %v664_v38 = vld [vmem:[#allocation5 + $0x30] sm:$0xff] }
 0x2ce   :  { %v579_v61 = vsel %vm576_vm15, %v578_v55, %v574_v56  ;;  %v977_v62 = vunpack.i.l.bf16 %v976_v59  ;;  %v565_v63 = vpop.xlane.xlu0 %564  ;;  %v982_v0 = vunpack.i.l.bf16 %v981_v58  ;;  %v978_v7 = vunpack.i.h.bf16 %v976_v59  ;;  %vm466_vm5 = vmor %vm464_vm4, %vm465_vm2 }
 0x2cf   :  { %v461_v2 = vsub.f32 1.0, %v460_v57  ;;  %1022 = vrcp.f32 %v565_v63  ;;  %v983_v8 = vunpack.i.h.bf16 %v981_v58  ;;  %v580_v10 = vmul.f32 %v1273_v30, %v579_v61 }
 0x2d0   :  { %500 = vmatpush.msrb.mxu1 %v982_v0  ;;  %622 = vmatpush.msra.mxu2 %v977_v62  ;;  %v592_v20 = vand.u32 2147483648, %v565_v63  ;;  %v590_v21 = vand.u32 2147483647, %v565_v63  ;;  %vm586_vm8 = vweird.f32 %v565_v63  ;;  %v1155_v58 = vmov 32.0  }
 0x2d1   :  { %v462_v1 = vmul.f32 %v1021_v54, %v461_v2  ;;  %1024 = vrcp.f32 %v1155_v58  ;;  %vm805_vm4 = vcmask 523264  }
 0x2d2   :  { %501 = vmatpush.msrb.mxu1 %v983_v8  ;;  %623 = vmatpush.msra.mxu2 %v978_v7  ;;  %v593_v23 = vor.u32 1.1754944e-38, %v592_v20  ;;  %vm591_vm10 = vcmp.eq.f32.partialorder %v590_v21, 8.507059e+37  ;;  %v769_v21 = vld [vmem:[#allocation5 + $0x90] sm:$0xff] }
 0x2d3   :  { %929 = vmatmul.msk.f32.vlgmr.msrb.gmra.mxu1 %vm181_vm3, %v458_v9  ;;  %935 = vmatmul.msk.f32.vlgmr.msra.gmra.mxu2 %vm181_vm3, %v580_v10  ;;  %v463_v12 = vadd.f32 %v1021_v54, %v462_v1 }
 0x2d5   :  { %v1023_v14 = vpop.eup %1022  ;;  %v467_v16 = vsel %vm466_vm5, %v1021_v54, %v463_v12 }
 0x2d6   :  { %v582_v17 = vmul.f32 %v1023_v14, %v565_v63  ;;  %v472_v15 = vsel %vm469_vm6, %v471_v13, %v467_v16  ;;  %vm587_vm7 = vweird.f32 %v1023_v14  ;;  %v760_v16 = vld [vmem:[#allocation5 + $0x50] sm:$0xff] }
 0x2d7   :  { %v473_v30 = vmul.f32 %v1278_v34, %v472_v15  ;;  %vm588_vm9 = vmor %vm586_vm8, %vm587_vm7  ;;  %v1025_v59 = vpop.eup %1024  ;;  %v758_v15 = vld [vmem:[#allocation5 + $0x40] sm:$0xff] }
 0x2d8   :  { %v583_v19 = vsub.f32 1.0, %v582_v17  ;;  %v706_v60 = vmul.f32 32.0, %v1025_v59  ;;  %v759_v17 = vld [vmem:[#allocation5 + $0x48] sm:$0xff] }
 0x2da   :  { %v584_v6 = vmul.f32 %v1023_v14, %v583_v19  ;;  %v707_v61 = vsub.f32 1.0, %v706_v60 }
 0x2db   :  { %930 = vmatmul.msk.f32.gmra.mxu1 %vm181_vm3, %v473_v30 }
 0x2dc   :  { %v585_v22 = vadd.f32 %v1023_v14, %v584_v6  ;;  %v708_v62 = vmul.f32 %v1025_v59, %v707_v61  ;;  %v770_v6 = vld [vmem:[#allocation5 + $0x98] sm:$0xff] }
 0x2dd   :  { %820 = vmatpush.msra.mxu3 %v770_v6 }
 0x2de   :  { %v589_v25 = vsel %vm588_vm9, %v1023_v14, %v585_v22  ;;  %v709_v63 = vadd.f32 %v1025_v59, %v708_v62  ;;  %v761_v14 = vld [vmem:[#allocation5 + $0x58] sm:$0xff] }
 0x2df   :  { %v594_v26 = vsel %vm591_vm10, %v593_v23, %v589_v25  ;;  %791 = vmatpush.msra.mxu1 %v761_v14  ;;  %v768_v25 = vld [vmem:[#allocation5 + $0x88] sm:$0xff]  ;;  %821 = vmatpush.msra.mxu3 %v769_v21 }
 0x2e0   :  { %v595_v27 = vmul.f32 %v1282_v36, %v594_v26  ;;  %v665_v36 = vld [vmem:[#allocation5 + $0x38] sm:$0xff] }
 0x2e1   :  { %686 = vmatpush.msra.mxu0 %v665_v36  ;;  %792 = vmatpush.msra.mxu1 %v760_v16 }
 0x2e2   :  { %936 = vmatmul.msk.f32.gmra.mxu2 %vm181_vm3, %v595_v27  ;;  %822 = vmatpush.msra.mxu3 %v768_v25 }
 0x2e3   :  { %687 = vmatpush.msra.mxu0 %v664_v38  ;;  %793 = vmatpush.msra.mxu1 %v759_v17  ;;  %v986_v38 = vld [vmem:[#allocation7 + $0x4] ss:$0 sm:$0xff] }
 0x2e5   :  { %688 = vmatpush.msra.mxu0 %v663_v39  ;;  %794 = vmatpush.msra.mxu1 %v758_v15 }
 0x2e7   :  { %689 = vmatpush.msra.mxu0 %v662_v40 }
 0x32c   :  { %v259_v28 = vpop.f32.mrf.mxu2 }
 0x334   :  { %v262_v29 = vpop.f32.mrf.mxu2 }
 0x344   :  { %v381_v31 = vpop.f32.mrf.mxu2 }
 0x34c   :  { %v384_v34 = vpop.f32.mrf.mxu2 }
 0x350   :  { %v503_v32 = vpop.f32.mrf.mxu1 }
 0x351   :  { %641 = vrot.lane.b32.xlu1 %v503_v32, %s1153_s10 }
 0x356   :  { %v625_v33 = vpop.f32.mrf.mxu2 }
 0x357   :  { %649 = vrot.lane.b32.xlu2 %v625_v33, %s1154_s11 }
 0x358   :  { %v506_v35 = vpop.f32.mrf.mxu1 }
 0x359   :  { %643 = vrot.lane.b32.xlu0 %v506_v35, %s1153_s10  ;;  %633 = vrot.lane.b32.xlu1 %v381_v31, %s1138_s21  ;;  %v766_v31 = vld [vmem:[#allocation5 + $0x78] sm:$0xff] }
 0x361   :  { %635 = vrot.lane.b32.xlu1 %v384_v34, %s1138_s21 }
 0x365   :  { %v628_v37 = vpop.f32.mrf.mxu2 }
 0x366   :  { %651 = vrot.lane.b32.xlu2 %v628_v37, %s1154_s11 }
 0x3b1   :  { %v650_v18 = vpop.permute.xlu2 %649 }
 0x3c0   :  { %v652_v49 = vpop.permute.xlu2 %651 }
 0x3c3   :  { %v642_v41 = vpop.permute.xlu1 %641 }
 0x3cb   :  { %v634_v42 = vpop.permute.xlu1 %633  ;;  %v644_v47 = vpop.permute.xlu0 %643 }
 0x3cc   :  { %v655_v43 = vsel %vm149_vm1, %v259_v28, %v634_v42  ;;  %v767_v28 = vld [vmem:[#allocation5 + $0x80] sm:$0xff] }
 0x3cd   :  { %v657_v44 = vsel %vm181_vm3, %v655_v43, %v642_v41  ;;  %823 = vmatpush.msra.mxu3 %v767_v28  ;;  %v987_v41 = vld [vmem:[#allocation7 + $0x5] ss:$0 sm:$0xff] }
 0x3ce   :  { %v660_v45 = vsel %vm659_vm11, %v657_v44, %v650_v18 }
 0x3cf   :  { %937 = vmatmul.msk.f32.vlgmr.msra.gmra.mxu0 %vm68_vm0, %v660_v45  ;;  %824 = vmatpush.msra.mxu3 %v766_v31 }
 0x3d3   :  { %v636_v46 = vpop.permute.xlu1 %635 }
 0x3d4   :  { %v656_v48 = vsel %vm149_vm1, %v262_v29, %v636_v46  ;;  %vm710_vm1 = vweird.f32 %v1025_v59 }
 0x3d5   :  { %v658_v50 = vsel %vm181_vm3, %v656_v48, %v644_v47  ;;  %v1334_v0 = vsel %vm710_vm1, %v1025_v59, %v709_v63 }
 0x3d6   :  { %v661_v51 = vsel %vm659_vm11, %v658_v50, %v652_v49 }
 0x3d7   :  { %938 = vmatmul.msk.f32.gmra.mxu0 %vm68_vm0, %v661_v51 }
 0x44c   :  { %v691_v53 = vpop.f32.mrf.mxu0 }
 0x44d   :  { %v692_v24 = vadd.f32 %v985_v52, %v691_v53  ;;  %v765_v53 = vld [vmem:[#allocation5 + $0x70] sm:$0xff] }
 0x44e   :  { %825 = vmatpush.msra.mxu3 %v765_v53 }
 0x44f   :  { %v699_v54 = vsel %vm68_vm0, %v692_v24, 0.0 }
 0x450   :  { %700 = vadd.xlane.f32.xlu1 %v699_v54  ;;  %v763_v54 = vld [vmem:[#allocation5 + $0x60] sm:$0xff] }
 0x454   :  { %v694_v55 = vpop.f32.mrf.mxu0 }
 0x455   :  { %v695_v56 = vadd.f32 %v985_v52, %v694_v55 }
 0x457   :  { %v702_v57 = vsel %vm68_vm0, %v695_v56, 0.0 }
 0x458   :  { %703 = vadd.xlane.f32.xlu2 %v702_v57 }
 0x4c3   :  { %v701_v2 = vpop.xlane.xlu1 %700 }
 0x4c4   :  { %v712_v3 = vmul.f32 %v1334_v0, %v701_v2 }
 0x4c6   :  { %v714_v7 = vsub.f32 %v692_v24, %v712_v3  ;;  %v764_v24 = vld [vmem:[#allocation5 + $0x68] sm:$0xff] }
 0x4c7   :  { %826 = vmatpush.msra.mxu3 %v764_v24 }
 0x4c8   :  { %v716_v8 = vmul.f32 %v714_v7, %v714_v7 }
 0x4c9   :  { %827 = vmatpush.msra.mxu3 %v763_v54 }
 0x4ca   :  { %v718_v9 = vsel %vm68_vm0, %v716_v8, 0.0 }
 0x4cb   :  { %719 = vadd.xlane.f32.xlu0 %v718_v9  ;;  %v704_v1 = vpop.xlane.xlu2 %703 }
 0x4cc   :  { %v713_v10 = vmul.f32 %v1334_v0, %v704_v1 }
 0x4ce   :  { %v715_v11 = vsub.f32 %v695_v56, %v713_v10 }
 0x4d0   :  { %v717_v12 = vmul.f32 %v715_v11, %v715_v11 }
 0x4d2   :  { %v721_v13 = vsel %vm68_vm0, %v717_v12, 0.0 }
 0x4d3   :  { %722 = vadd.xlane.f32.xlu1 %v721_v13 }
 0x53e   :  { %v720_v19 = vpop.xlane.xlu0 %719 }
 0x53f   :  { %v724_v20 = vmul.f32 %v720_v19, %v1334_v0 }
 0x541   :  { %v726_v30 = vadd.f32 1e-05, %v724_v20 }
 0x543   :  { %1026 = vrsqrt.f32 %v726_v30  ;;  %vm734_vm12 = vweird.f32 %v726_v30 }
 0x546   :  { %v723_v22 = vpop.xlane.xlu1 %722 }
 0x547   :  { %v725_v23 = vmul.f32 %v723_v22, %v1334_v0 }
 0x549   :  { %v1027_v26 = vpop.eup %1026  ;;  %v727_v27 = vadd.f32 1e-05, %v725_v23 }
 0x54a   :  { %v729_v29 = vmul.f32 %v1027_v26, %v726_v30  ;;  %vm735_vm3 = vweird.f32 %v1027_v26 }
 0x54b   :  { %1028 = vrsqrt.f32 %v727_v27  ;;  %vm736_vm13 = vmor %vm734_vm12, %vm735_vm3  ;;  %vm744_vm15 = vweird.f32 %v727_v27 }
 0x54c   :  { %v730_v34 = vmul.f32 %v1027_v26, %v729_v29 }
 0x54e   :  { %v731_v32 = vmul.f32 0.5, %v730_v34  ;;  %v990_v34 = vld [vmem:[#allocation7 + $0x6] ss:$0 sm:$0xff] }
 0x550   :  { %v732_v33 = vsub.f32 1.5, %v731_v32 }
 0x551   :  { %v1029_v35 = vpop.eup %1028 }
 0x552   :  { %v733_v37 = vmul.f32 %v1027_v26, %v732_v33  ;;  %v739_v36 = vmul.f32 %v1029_v35, %v727_v27  ;;  %vm745_vm14 = vweird.f32 %v1029_v35 }
 0x553   :  { %vm746_vm2 = vmor %vm744_vm15, %vm745_vm14 }
 0x554   :  { %v737_v39 = vsel %vm736_vm13, %v1027_v26, %v733_v37  ;;  %v740_v40 = vmul.f32 %v1029_v35, %v739_v36  ;;  %v991_v37 = vld [vmem:[#allocation7 + $0x7] ss:$0 sm:$0xff] }
 0x555   :  { %v748_v42 = vmul.f32 %v737_v39, %v714_v7 }
 0x556   :  { %v741_v43 = vmul.f32 0.5, %v740_v40 }
 0x557   :  { %v751_v18 = vmul.f32 %v986_v38, %v748_v42 }
 0x558   :  { %v742_v44 = vsub.f32 1.5, %v741_v43 }
 0x559   :  { %v754_v45 = vadd.f32 %v987_v41, %v751_v18 }
 0x55a   :  { %v743_v46 = vmul.f32 %v1029_v35, %v742_v44 }
 0x55b   :  { %v1343_v47 = vadd.f32 %v754_v45, %v1192_v4  ;;  %v988_v4 = vld [vmem:[#allocation7 + $0x2] ss:$0 sm:$0xff] }
 0x55c   :  { %v747_v48 = vsel %vm746_vm2, %v1029_v35, %v743_v46 }
 0x55d   :  { %v749_v49 = vmul.f32 %v747_v48, %v715_v11  ;;  %939 = vmatmul.msk.f32.vlgmr.msra.gmra.mxu1 %vm68_vm0, %v1343_v47 }
 0x55f   :  { %v752_v50 = vmul.f32 %v986_v38, %v749_v49 }
 0x561   :  { %v755_v51 = vadd.f32 %v987_v41, %v752_v50 }
 0x563   :  { %v1348_v52 = vadd.f32 %v755_v51, %v1196_v5  ;;  %v989_v5 = vld [vmem:[#allocation7 + $0x3] ss:$0 sm:$0xff] }
 0x565   :  { %940 = vmatmul.msk.f32.gmra.mxu1 %vm68_vm0, %v1348_v52 }
 0x5da   :  { %v796_v55 = vpop.f32.mrf.mxu1 }
 0x5db   :  { %v797_v56 = vadd.f32 %v988_v4, %v796_v55 }
 0x5dd   :  { %v802_v57 = vmax.f32 %v797_v56, 0.0 }
 0x5df   :  { %941 = vmatmul.msk.f32.vlgmr.msra.gmra.mxu3 %vm805_vm4, %v802_v57 }
 0x5e2   :  { %v799_v58 = vpop.f32.mrf.mxu1 }
 0x5e3   :  { %v800_v59 = vadd.f32 %v988_v4, %v799_v58 }
 0x5e5   :  { %v803_v60 = vmax.f32 %v800_v59, 0.0 }
 0x5e7   :  { %942 = vmatmul.msk.f32.gmra.mxu3 %vm805_vm4, %v803_v60 }
 0x662   :  { %v829_v61 = vpop.f32.mrf.mxu3 }
 0x663   :  { %v830_v62 = vadd.f32 %v989_v5, %v829_v61 }
 0x665   :  { %v837_v63 = vsel %vm68_vm0, %v830_v62, 0.0 }
 0x666   :  { %838 = vadd.xlane.f32.xlu2 %v837_v63 }
 0x66a   :  { %v832_v2 = vpop.f32.mrf.mxu3 }
 0x66b   :  { %v833_v3 = vadd.f32 %v989_v5, %v832_v2 }
 0x66d   :  { %v840_v7 = vsel %vm68_vm0, %v833_v3, 0.0 }
 0x66e   :  { %841 = vadd.xlane.f32.xlu1 %v840_v7 }
 0x6d9   :  { %v839_v8 = vpop.xlane.xlu2 %838 }
 0x6da   :  { %v843_v9 = vmul.f32 %v839_v8, %v1334_v0 }
 0x6dc   :  { %v845_v1 = vsub.f32 %v830_v62, %v843_v9 }
 0x6de   :  { %v847_v10 = vmul.f32 %v845_v1, %v845_v1 }
 0x6e0   :  { %v849_v11 = vsel %vm68_vm0, %v847_v10, 0.0 }
 0x6e1   :  { %v842_v12 = vpop.xlane.xlu1 %841  ;;  %850 = vadd.xlane.f32.xlu2 %v849_v11 }
 0x6e2   :  { %v844_v13 = vmul.f32 %v842_v12, %v1334_v0 }
 0x6e4   :  { %v846_v14 = vsub.f32 %v833_v3, %v844_v13 }
 0x6e6   :  { %v848_v16 = vmul.f32 %v846_v14, %v846_v14 }
 0x6e8   :  { %v852_v17 = vsel %vm68_vm0, %v848_v16, 0.0 }
 0x6e9   :  { %853 = vadd.xlane.f32.xlu1 %v852_v17 }
 0x754   :  { %v851_v15 = vpop.xlane.xlu2 %850 }
 0x755   :  { %v855_v19 = vmul.f32 %v851_v15, %v1334_v0 }
 0x757   :  { %v857_v20 = vadd.f32 1e-05, %v855_v19 }
 0x759   :  { %1030 = vrsqrt.f32 %v857_v20  ;;  %vm865_vm6 = vweird.f32 %v857_v20 }
 0x75c   :  { %v854_v30 = vpop.xlane.xlu1 %853 }
 0x75d   :  { %v856_v6 = vmul.f32 %v854_v30, %v1334_v0 }
 0x75f   :  { %v1031_v21 = vpop.eup %1030  ;;  %v858_v22 = vadd.f32 1e-05, %v856_v6 }
 0x760   :  { %v860_v23 = vmul.f32 %v1031_v21, %v857_v20  ;;  %vm866_vm5 = vweird.f32 %v1031_v21 }
 0x761   :  { %1032 = vrsqrt.f32 %v858_v22  ;;  %vm867_vm7 = vmor %vm865_vm6, %vm866_vm5  ;;  %vm875_vm9 = vweird.f32 %v858_v22 }
 0x762   :  { %v861_v25 = vmul.f32 %v1031_v21, %v860_v23 }
 0x764   :  { %v862_v26 = vmul.f32 0.5, %v861_v25 }
 0x766   :  { %v863_v27 = vsub.f32 1.5, %v862_v26 }
 0x767   :  { %v1033_v28 = vpop.eup %1032 }
 0x768   :  { %v864_v29 = vmul.f32 %v1031_v21, %v863_v27  ;;  %v870_v31 = vmul.f32 %v1033_v28, %v858_v22  ;;  %vm876_vm8 = vweird.f32 %v1033_v28 }
 0x769   :  { %vm877_vm10 = vmor %vm875_vm9, %vm876_vm8 }
 0x76a   :  { %v868_v32 = vsel %vm867_vm7, %v1031_v21, %v864_v29  ;;  %v871_v33 = vmul.f32 %v1033_v28, %v870_v31 }
 0x76b   :  { %v879_v35 = vmul.f32 %v868_v32, %v845_v1 }
 0x76c   :  { %v872_v36 = vmul.f32 0.5, %v871_v33 }
 0x76d   :  { %v882_v0 = vmul.f32 %v990_v34, %v879_v35 }
 0x76e   :  { %v873_v38 = vsub.f32 1.5, %v872_v36 }
 0x76f   :  { %v885_v39 = vadd.f32 %v991_v37, %v882_v0 }
 0x770   :  { %v874_v40 = vmul.f32 %v1033_v28, %v873_v38 }
 0x771   :  { %v887_v41 = vadd.f32 %v885_v39, %v1343_v47 }
 0x772   :  { %v878_v42 = vsel %vm877_vm10, %v1033_v28, %v874_v40 }
 0x773   :  { %v880_v43 = vmul.f32 %v878_v42, %v846_v14  ;;  %889 = vst.msk [vmem:[#allocation8] sm:$0xff] %vm68_vm0, %v887_v41 }
 0x775   :  { %v883_v18 = vmul.f32 %v990_v34, %v880_v43 }
 0x777   :  { %v886_v44 = vadd.f32 %v991_v37, %v883_v18 }
 0x779   :  { %v888_v45 = vadd.f32 %v886_v44, %v1348_v52 }
 0x77b   :  { %890 = vst.msk [vmem:[#allocation8 + $0x8] sm:$0xff] %vm68_vm0, %v888_v45 }
 0x77c   :  { %903 = dma.vmem_to_hbm [thread:$0]  %s896_s13, 256, %s898_s16, [#allocation4], %s1137_s20, %s1137_s20, %s1138_s21  }
 0x77d   :  { %1134 = dma.done.wait [#allocation4], 256  }
 0x77e   :  { %1135 = vsyncadd [#allocation4], 4294967040 }
 0x77f   :  { %908 = vsyncpa [#allocation3], 1 }
 0x780   :  { %909 = vsyncpa [#allocation6], 1 }
 0x781   :  { %910 = vsyncpa [#allocation4], 1 }

</bundles_post_ra>
